<compile_context>
chip_gen: v5e
topology: v5e:2x2
jax: 0.10.0
libtpu: 0.0.40
codegen_flags: <defaults>
</compile_context>

<pallas_src>
import math

import jax
import jax.numpy as jnp
from jax.experimental import pallas as pl
from jax.experimental.pallas import tpu as pltpu


def _round_up(x, m):
    return (x + m - 1) // m * m


def ffn_kernel(x_ref, w1_ref, b1_ref, w2_ref, b2_ref, o_ref, acc_ref):
    # x_ref:  (tm, d_pad)    bf16
    # w1_ref: (d_pad, tdff)  bf16    b1_ref: (1, tdff)  f32
    # w2_ref: (tdff, d_pad)  bf16    b2_ref: (1, d_pad) f32
    # o_ref:  (tm, d_pad)    output dtype
    # acc_ref:(tm, d_pad)    f32 scratch, persists across the dff (last) grid axis
    j = pl.program_id(1)

    @pl.when(j == 0)
    def _():
        acc_ref[...] = jnp.zeros_like(acc_ref)

    # First matmul chunk + bias + ReLU (epilogue in f32, matmul on bf16 inputs).
    h = jnp.dot(x_ref[...], w1_ref[...], preferred_element_type=jnp.float32)
    h = jnp.maximum(h + b1_ref[...], 0.0)

    # Second matmul chunk accumulated into the f32 accumulator.
    acc_ref[...] += jnp.dot(h.astype(w2_ref.dtype), w2_ref[...],
                            preferred_element_type=jnp.float32)

    @pl.when(j == pl.num_programs(1) - 1)
    def _():
        o_ref[...] = (acc_ref[...] + b2_ref[...]).astype(o_ref.dtype)


def feed_forward(x, w1, b1, w2, b2, *, tm=256, tdff=512):
    """x: (B, S, d_model) -> (B, S, d_model).  w1:(d_model,dff) b1:(1,dff)
    w2:(dff,d_model) b2:(1,d_model)."""
    B, S, d_model = x.shape
    dff = w1.shape[1]
    out_dtype = x.dtype
    compute_dtype = jnp.bfloat16

    M = B * S

    # --- tile sizing / padding (lane-dense, sublane-aligned) -----------------
    tm = max(8, min(tm, _round_up(M, 8)))
    tm = _round_up(tm, 8)
    M_pad = _round_up(M, tm)

    d_pad = _round_up(d_model, 128)

    dff_pad = _round_up(dff, 128)
    tdff = _round_up(min(tdff, dff_pad), 128)
    dff_pad = _round_up(dff_pad, tdff)

    grid_m = M_pad // tm
    grid_k = dff_pad // tdff

    # --- pad + cast operands --------------------------------------------------
    x2d = x.reshape(M, d_model)
    x2d = jnp.pad(x2d, ((0, M_pad - M), (0, d_pad - d_model))).astype(compute_dtype)
    w1p = jnp.pad(w1, ((0, d_pad - d_model), (0, dff_pad - dff))).astype(compute_dtype)
    w2p = jnp.pad(w2, ((0, dff_pad - dff), (0, d_pad - d_model))).astype(compute_dtype)
    b1p = jnp.pad(b1, ((0, 0), (0, dff_pad - dff))).astype(jnp.float32)
    b2p = jnp.pad(b2, ((0, 0), (0, d_pad - d_model))).astype(jnp.float32)

    # --- VMEM budget (double-buffered tiles + accumulator), with headroom -----
    est = (
        2 * tm * d_pad * 2          # x tile (bf16, double-buffered)
        + 2 * d_pad * tdff * 2      # W1 tile
        + 2 * 8 * tdff * 4          # b1 tile (sublane-padded, f32)
        + 2 * tdff * d_pad * 2      # W2 tile
        + 2 * 8 * d_pad * 4         # b2 tile
        + 2 * tm * d_pad * jnp.dtype(out_dtype).itemsize  # out tile
        + tm * d_pad * 4            # f32 accumulator scratch
    )
    vmem_limit = int(min(max(2 * est, 32 * 1024 * 1024), 64 * 1024 * 1024))

    # --- advisory cost estimate for XLA's scheduler ---------------------------
    flops = 4 * M_pad * d_pad * dff_pad          # two matmuls, 2*M*N*K each
    bytes_accessed = (
        M_pad * d_pad * 2
        + grid_m * d_pad * dff_pad * 2           # W1 re-streamed per row tile
        + grid_m * dff_pad * d_pad * 2           # W2 re-streamed per row tile
        + dff_pad * 4 + d_pad * 4
        + M_pad * d_pad * jnp.dtype(out_dtype).itemsize
    )
    cost = pl.CostEstimate(flops=flops, transcendentals=0,
                           bytes_accessed=bytes_accessed)

    out2d = pl.pallas_call(
        ffn_kernel,
        out_shape=jax.ShapeDtypeStruct((M_pad, d_pad), out_dtype),
        grid_spec=pltpu.PrefetchScalarGridSpec(
            num_scalar_prefetch=0,
            grid=(grid_m, grid_k),
            in_specs=[
                pl.BlockSpec((tm, d_pad), lambda i, j: (i, 0)),     # x rows
                pl.BlockSpec((d_pad, tdff), lambda i, j: (0, j)),   # W1 chunk
                pl.BlockSpec((1, tdff), lambda i, j: (0, j)),       # b1 chunk
                pl.BlockSpec((tdff, d_pad), lambda i, j: (j, 0)),   # W2 chunk
                pl.BlockSpec((1, d_pad), lambda i, j: (0, 0)),      # b2
            ],
            out_specs=pl.BlockSpec((tm, d_pad), lambda i, j: (i, 0)),
            scratch_shapes=[pltpu.VMEM((tm, d_pad), jnp.float32)],
        ),
        compiler_params=pltpu.CompilerParams(
            dimension_semantics=("parallel", "arbitrary"),
            vmem_limit_bytes=vmem_limit),
        cost_estimate=cost,
    )(x2d, w1p, b1p, w2p, b2p)

    return out2d[:M, :d_model].reshape(B, S, d_model)


def init_linear_params(key, in_features, out_features, dtype=jnp.float32):
    """Match PyTorch nn.Linear default init: U(-1/sqrt(fan_in), 1/sqrt(fan_in)).

    Returns W with shape (in_features, out_features) (transposed vs PyTorch)
    and bias with shape (1, out_features)."""
    kw, kb = jax.random.split(key)
    bound = 1.0 / math.sqrt(in_features)
    w = jax.random.uniform(kw, (in_features, out_features), dtype,
                           minval=-bound, maxval=bound)
    b = jax.random.uniform(kb, (1, out_features), dtype,
                           minval=-bound, maxval=bound)
    return w, b


if __name__ == "__main__":
    # Small but lane-aligned demo shapes (multiples of 128 on matmul dims).
    d_model, dff = 128, 256
    B, S = 2, 8

    root = jax.random.PRNGKey(0)
    kx, k1, k2 = jax.random.split(root, 3)

    x = jax.random.normal(kx, (B, S, d_model), jnp.float32)
    w1, b1 = init_linear_params(k1, d_model, dff)
    w2, b2 = init_linear_params(k2, dff, d_model)

    out = feed_forward(x, w1, b1, w2, b2)
    out = jax.block_until_ready(out)

    # Reference in plain JAX following the same bf16-weight / f32-accumulate path.
    f32 = jnp.float32
    hi = jax.lax.Precision.HIGHEST
    xb = x.astype(jnp.bfloat16).astype(f32)
    w1b = w1.astype(jnp.bfloat16).astype(f32)
    w2b = w2.astype(jnp.bfloat16).astype(f32)
    h = jnp.maximum(jnp.einsum("bsd,df->bsf", xb, w1b, precision=hi) + b1[0], 0.0)
    h = h.astype(jnp.bfloat16).astype(f32)
    ref = jnp.einsum("bsf,fd->bsd", h, w2b, precision=hi) + b2[0]

    assert out.shape == (B, S, d_model)
    max_err = float(jnp.max(jnp.abs(out - ref)))
    assert jnp.allclose(out, ref, atol=2e-2, rtol=2e-2), max_err

    print("KERNEL_OK")
</pallas_src>

<mosaic_0001>
module attributes {stable_mosaic.version = 11 : i64} {
  func.func @ffn_kernel(%arg0: i32, %arg1: i32, %arg2: memref<16x128xbf16, #tpu.memory_space<vmem>>, %arg3: memref<128x256xbf16, #tpu.memory_space<vmem>>, %arg4: memref<1x256xf32, #tpu.memory_space<vmem>>, %arg5: memref<256x128xbf16, #tpu.memory_space<vmem>>, %arg6: memref<1x128xf32, #tpu.memory_space<vmem>>, %arg7: memref<16x128xf32, #tpu.memory_space<vmem>>, %arg8: memref<16x128xf32, #tpu.memory_space<vmem>>) attributes {dimension_semantics = [#tpu.dimension_semantics<parallel>, #tpu.dimension_semantics<arbitrary>], iteration_bounds = array<i64: 1, 1>, scalar_prefetch = 0 : i64, scratch_operands = 1 : i64, tpu.core_type = #tpu.core_type<tc>, window_params = [{transform_indices = @transform_0, window_bounds = array<i64: 16, 128>}, {transform_indices = @transform_1, window_bounds = array<i64: 128, 256>}, {transform_indices = @transform_2, window_bounds = array<i64: 1, 256>}, {transform_indices = @transform_3, window_bounds = array<i64: 256, 128>}, {pipeline_mode = #tpu.pipeline_mode<synchronous>, transform_indices = @transform_4, window_bounds = array<i64: 1, 128>}, {transform_indices = @transform_5, window_bounds = array<i64: 16, 128>}]} {
    %c0_i32 = arith.constant 0 : i32
    %0 = arith.cmpi eq, %arg1, %c0_i32 : i32
    %1 = arith.extui %0 : i1 to i32
    %c0_i32_0 = arith.constant 0 : i32
    %2 = arith.cmpi ne, %1, %c0_i32_0 : i32
    scf.if %2 {
      %cst_16 = arith.constant 0.000000e+00 : f32
      %20 = vector.broadcast %cst_16 : f32 to vector<16x128xf32>
      %c0_17 = arith.constant 0 : index
      %c0_18 = arith.constant 0 : index
      %21 = vector.load %arg8[%c0_17, %c0_18] : memref<16x128xf32, #tpu.memory_space<vmem>>, vector<16x128xf32>
      tpu.vector_store %arg8[%c0_17, %c0_18], %20 {strides = array<i32>} : memref<16x128xf32, #tpu.memory_space<vmem>>, vector<16x128xf32>,
    } else {
    }
    %c0 = arith.constant 0 : index
    %c0_1 = arith.constant 0 : index
    %3 = vector.load %arg2[%c0, %c0_1] : memref<16x128xbf16, #tpu.memory_space<vmem>>, vector<16x128xbf16>
    %c0_2 = arith.constant 0 : index
    %c0_3 = arith.constant 0 : index
    %4 = vector.load %arg3[%c0_2, %c0_3] : memref<128x256xbf16, #tpu.memory_space<vmem>>, vector<128x256xbf16>
    %cst = arith.constant dense<0.000000e+00> : vector<16x256xf32>
    %5 = tpu.matmul %3, %4, %cst {dimension_numbers = #tpu.dot_dimension_numbers<[1], [0], [0], [1], [0, 0, 1, 1], [], []>} : vector<16x128xbf16>, vector<128x256xbf16>, vector<16x256xf32> -> vector<16x256xf32>
    %c0_4 = arith.constant 0 : index
    %c0_5 = arith.constant 0 : index
    %6 = vector.load %arg4[%c0_4, %c0_5] : memref<1x256xf32, #tpu.memory_space<vmem>>, vector<1x256xf32>
    %7 = vector.broadcast %6 : vector<1x256xf32> to vector<16x256xf32>
    %8 = arith.addf %5, %7 : vector<16x256xf32>
    %cst_6 = arith.constant 0.000000e+00 : f32
    %9 = vector.broadcast %cst_6 : f32 to vector<16x256xf32>
    %10 = arith.maximumf %8, %9 : vector<16x256xf32>
    %c0_7 = arith.constant 0 : index
    %c0_8 = arith.constant 0 : index
    %11 = vector.load %arg8[%c0_7, %c0_8] : memref<16x128xf32, #tpu.memory_space<vmem>>, vector<16x128xf32>
    %12 = arith.truncf %10 : vector<16x256xf32> to vector<16x256xbf16>
    %c0_9 = arith.constant 0 : index
    %c0_10 = arith.constant 0 : index
    %13 = vector.load %arg5[%c0_9, %c0_10] : memref<256x128xbf16, #tpu.memory_space<vmem>>, vector<256x128xbf16>
    %cst_11 = arith.constant dense<0.000000e+00> : vector<16x128xf32>
    %14 = tpu.matmul %12, %13, %cst_11 {dimension_numbers = #tpu.dot_dimension_numbers<[1], [0], [0], [1], [0, 0, 1, 1], [], []>} : vector<16x256xbf16>, vector<256x128xbf16>, vector<16x128xf32> -> vector<16x128xf32>
    %15 = arith.addf %11, %14 : vector<16x128xf32>
    %c0_12 = arith.constant 0 : index
    %c0_13 = arith.constant 0 : index
    %16 = vector.load %arg8[%c0_12, %c0_13] : memref<16x128xf32, #tpu.memory_space<vmem>>, vector<16x128xf32>
    tpu.vector_store %arg8[%c0_12, %c0_13], %15 {strides = array<i32>} : memref<16x128xf32, #tpu.memory_space<vmem>>, vector<16x128xf32>,
    %c0_i32_14 = arith.constant 0 : i32
    %17 = arith.cmpi eq, %arg1, %c0_i32_14 : i32
    %18 = arith.extui %17 : i1 to i32
    %c0_i32_15 = arith.constant 0 : i32
    %19 = arith.cmpi ne, %18, %c0_i32_15 : i32
    scf.if %19 {
      %c0_16 = arith.constant 0 : index
      %c0_17 = arith.constant 0 : index
      %20 = vector.load %arg8[%c0_16, %c0_17] : memref<16x128xf32, #tpu.memory_space<vmem>>, vector<16x128xf32>
      %c0_18 = arith.constant 0 : index
      %c0_19 = arith.constant 0 : index
      %21 = vector.load %arg6[%c0_18, %c0_19] : memref<1x128xf32, #tpu.memory_space<vmem>>, vector<1x128xf32>
      %22 = vector.broadcast %21 : vector<1x128xf32> to vector<16x128xf32>
      %23 = arith.addf %20, %22 : vector<16x128xf32>
      %c0_20 = arith.constant 0 : index
      %c0_21 = arith.constant 0 : index
      %24 = vector.load %arg7[%c0_20, %c0_21] : memref<16x128xf32, #tpu.memory_space<vmem>>, vector<16x128xf32>
      tpu.vector_store %arg7[%c0_20, %c0_21], %23 {strides = array<i32>} : memref<16x128xf32, #tpu.memory_space<vmem>>, vector<16x128xf32>,
    } else {
    }
    return
  }
  func.func @transform_0(%arg0: i32, %arg1: i32) -> (i32, i32) {
    %c0_i32 = arith.constant 0 : i32
    %c0_i32_0 = arith.constant 0 : i32
    return %arg0, %c0_i32 : i32, i32
  }
  func.func @transform_1(%arg0: i32, %arg1: i32) -> (i32, i32) {
    %c0_i32 = arith.constant 0 : i32
    %c0_i32_0 = arith.constant 0 : i32
    return %c0_i32, %arg1 : i32, i32
  }
  func.func @transform_2(%arg0: i32, %arg1: i32) -> (i32, i32) {
    %c0_i32 = arith.constant 0 : i32
    %c0_i32_0 = arith.constant 0 : i32
    return %c0_i32, %arg1 : i32, i32
  }
  func.func @transform_3(%arg0: i32, %arg1: i32) -> (i32, i32) {
    %c0_i32 = arith.constant 0 : i32
    %c0_i32_0 = arith.constant 0 : i32
    return %arg1, %c0_i32 : i32, i32
  }
  func.func @transform_4(%arg0: i32, %arg1: i32) -> (i32, i32) {
    %c0_i32 = arith.constant 0 : i32
    %c0_i32_0 = arith.constant 0 : i32
    %c0_i32_1 = arith.constant 0 : i32
    return %c0_i32, %c0_i32_0 : i32, i32
  }
  func.func @transform_5(%arg0: i32, %arg1: i32) -> (i32, i32) {
    %c0_i32 = arith.constant 0 : i32
    %c0_i32_0 = arith.constant 0 : i32
    return %arg0, %c0_i32 : i32, i32
  }
}

</mosaic_0001>

<bundles_post_ra>
// kernel: tpu_custom_call.1
= control target key start
LH: loop header
LB: loop body
LE: loop exit
PB: predicated region body
PF: predicated region fallthrough
CT: control target
= control target key end

     0   :  { %10 = vsyncpa [#allocation4], 0  ;;  %s794_s0 = inlined_call_operand.hbm [shape: bf16[16,128], index: 0, kind: input, shape index: {}]   ;;  %s795_s1 = inlined_call_operand.hbm [shape: bf16[128,256], index: 1, kind: input, shape index: {}]   ;;  %s796_s2 = inlined_call_operand.hbm [shape: f32[1,256], index: 2, kind: input, shape index: {}]   ;;  %s797_s3 = inlined_call_operand.hbm [shape: bf16[256,128], index: 3, kind: input, shape index: {}]   ;;  %s798_s4 = inlined_call_operand.vmem [shape: f32[1,128], index: 4, kind: input, shape index: {}]   ;;  %s799_s5 = inlined_call_operand.hbm [shape: f32[16,128], index: 5, kind: output, shape index: {}]  }
   0x1   :  { %11 = vsyncpa [#allocation7], 0 }
   0x2   :  { %12 = vsyncpa [#allocation10], 0  ;;  %s31_s20 = sshll.u32 %s795_s1, 4  ;;  %s32_s20 = int_to_ptr.hbm [resolvable:$true] %s31_s20 }
   0x3   :  { %13 = vsyncpa [#allocation5], 0  ;;  %s731_s21 = smov [#allocation6]   ;;  %s18_s25 = sshll.u32 %s794_s0, 4  ;;  %s19_s25 = int_to_ptr.hbm [resolvable:$true] %s18_s25 }
   0x4   :  { %s33_s22 = sshll.u32 %s731_s21, 4  ;;  %s732_s26 = smov 128   ;;  %s34_s22 = int_to_ptr.vmem [resolvable:$true] %s33_s22 }
   0x5   :  { %s733_s27 = smov 8   ;;  %s734_s28 = smov [#allocation3]  }
   0x6   :  { %39 = dma.hbm_to_vmem [thread:$0]  %s32_s20, 2048, %s34_s22, [#allocation7], %s732_s26, %s732_s26, %s733_s27  }
   0x7   :  { %s20_s29 = sshll.u32 %s734_s28, 4  ;;  %s735_s1 = smov 64   ;;  %s21_s29 = int_to_ptr.vmem [resolvable:$true] %s20_s29 }
   0x8   :  { %s736_s30 = smov 4   ;;  %s45_s8 = sshll.u32 %s796_s2, 4  ;;  %s46_s8 = int_to_ptr.hbm [resolvable:$true] %s45_s8 }
   0x9   :  { %26 = dma.hbm_to_vmem [thread:$0]  %s19_s25, 128, %s21_s29, [#allocation4], %s735_s1, %s735_s1, %s736_s30  }
   0xa   :  { %s737_s9 = smov [#allocation8]   ;;  %s55_s12 = sshll.u32 %s797_s3, 4  ;;  %s56_s12 = int_to_ptr.hbm [resolvable:$true] %s55_s12 }
   0xb   :  { %s47_s0 = sshll.u32 %s737_s9, 4  ;;  %s738_s13 = smov [#allocation9]   ;;  %s48_s0 = int_to_ptr.vmem [resolvable:$true] %s47_s0 }
   0xc   :  { %50 = dma.hbm_to_vmem [thread:$0]  %s46_s8, 32, %s48_s0, [#allocation7]  }
   0xd   :  { %s57_s14 = sshll.u32 %s738_s13, 4  ;;  %s58_s14 = int_to_ptr.vmem [resolvable:$true] %s57_s14 }
   0xe   :  { %63 = dma.hbm_to_vmem [thread:$0]  %s56_s12, 2048, %s58_s14, [#allocation10], %s735_s1, %s735_s1, %s736_s30  }
   0xf   :  { %723 = dma.done.wait [#allocation4], 128  }
  0x10   :  { %724 = vsyncadd [#allocation4], 4294967168 }
  0x11   :  { %725 = dma.done.wait [#allocation7], 2080  }
  0x12   :  { %726 = vsyncadd [#allocation7], 4294965216 }
  0x13   :  { %727 = dma.done.wait [#allocation10], 2048  }
  0x14   :  { %728 = vsyncadd [#allocation10], 4294965248  ;;  %v490_v0 = vld [vmem:[#allocation6 + $0x70] sm:$0xf]  ;;  %v576_v1 = vld [vmem:[#allocation6 + $0x74] sm:$0xf0] }
  0x15   :  { %v575_v2 = vld [vmem:[#allocation6 + $0x74] sm:$0xf]  ;;  %v491_v3 = vor.u32 %v576_v1, %v490_v0  ;;  %v492_v4 = vld [vmem:[#allocation6 + $0x78] sm:$0xf0]  ;;  %v482_v5 = vld [vmem:[#allocation6 + $0x60] sm:$0xf] }
  0x16   :  { %v574_v6 = vld [vmem:[#allocation6 + $0x64] sm:$0xf0]  ;;  %v495_v7 = vor.u32 %v575_v2, %v492_v4  ;;  %v573_v8 = vld [vmem:[#allocation6 + $0x64] sm:$0xf]  ;;  %v484_v9 = vld [vmem:[#allocation6 + $0x68] sm:$0xf0] }
  0x17   :  { %198 = vmatpush.bf16.msra.mxu0 %v491_v3  ;;  %v483_v10 = vor.u32 %v574_v6, %v482_v5  ;;  %v487_v11 = vor.u32 %v573_v8, %v484_v9  ;;  %v474_v12 = vld [vmem:[#allocation6 + $0x50] sm:$0xf]  ;;  %v572_v13 = vld [vmem:[#allocation6 + $0x54] sm:$0xf0]  ;;  %v571_v14 = vld [vmem:[#allocation6 + $0x54] sm:$0xf] }
  0x18   :  { %212 = vmatpush.bf16.msra.mxu1 %v495_v7  ;;  %v476_v15 = vld [vmem:[#allocation6 + $0x58] sm:$0xf0]  ;;  %v475_v16 = vor.u32 %v572_v13, %v474_v12  ;;  %v466_v18 = vld [vmem:[#allocation6 + $0x40] sm:$0xf]  ;;  %v570_v19 = vld [vmem:[#allocation6 + $0x44] sm:$0xf0] }
  0x19   :  { %v479_v17 = vor.u32 %v571_v14, %v476_v15  ;;  %v569_v20 = vld [vmem:[#allocation6 + $0x44] sm:$0xf]  ;;  %v468_v21 = vld [vmem:[#allocation6 + $0x48] sm:$0xf0]  ;;  %v467_v22 = vor.u32 %v570_v19, %v466_v18  ;;  %v584_v23 = vld [vmem:[#allocation9 + $0x38] sm:$0xff]  ;;  %s739_s15 = smov [#allocation11]  }
  0x1a   :  { %v592_v24 = vld [vmem:[#allocation9 + $0x78] sm:$0xff]  ;;  %v471_v25 = vor.u32 %v569_v20, %v468_v21  ;;  %v458_v26 = vld [vmem:[#allocation6 + $0x30] sm:$0xf]  ;;  %v567_v28 = vld [vmem:[#allocation6 + $0x34] sm:$0xf]  ;;  %362 = vmatpush.bf16.msra.mxu2 %v584_v23  ;;  %s411_s16 = sshll.u32 %s739_s15, 4  ;;  %s412_s16 = int_to_ptr.vmem [resolvable:$true] %s411_s16 }
  0x1b   :  { %199 = vmatpush.bf16.msra.mxu0 %v483_v10  ;;  %v568_v27 = vld [vmem:[#allocation6 + $0x34] sm:$0xf0]  ;;  %v460_v29 = vld [vmem:[#allocation6 + $0x38] sm:$0xf0]  ;;  %376 = vmatpush.bf16.msra.mxu3 %v592_v24  ;;  %v450_v34 = vld [vmem:[#allocation6 + $0x20] sm:$0xf] }
  0x1c   :  { %213 = vmatpush.bf16.msra.mxu1 %v487_v11  ;;  %v583_v30 = vld [vmem:[#allocation9 + $0x30] sm:$0xff]  ;;  %v459_v32 = vor.u32 %v568_v27, %v458_v26  ;;  %v463_v33 = vor.u32 %v567_v28, %v460_v29  ;;  %v566_v35 = vld [vmem:[#allocation6 + $0x24] sm:$0xf0]  ;;  %v565_v36 = vld [vmem:[#allocation6 + $0x24] sm:$0xf]  ;;  %s413_s19 = sshll.u32 %s799_s5, 4  ;;  %s414_s19 = int_to_ptr.hbm [resolvable:$true] %s413_s19 }
  0x1d   :  { %v591_v31 = vld [vmem:[#allocation9 + $0x70] sm:$0xff]  ;;  %v452_v37 = vld [vmem:[#allocation6 + $0x28] sm:$0xf0]  ;;  %v451_v40 = vor.u32 %v566_v35, %v450_v34  ;;  %v444_v45 = vld [vmem:[#allocation6 + $0x18] sm:$0xf0] }
  0x1e   :  { %363 = vmatpush.bf16.msra.mxu2 %v583_v30  ;;  %v582_v38 = vld [vmem:[#allocation9 + $0x28] sm:$0xff]  ;;  %v455_v41 = vor.u32 %v565_v36, %v452_v37  ;;  %v564_v43 = vld [vmem:[#allocation6 + $0x14] sm:$0xf0]  ;;  %v563_v44 = vld [vmem:[#allocation6 + $0x14] sm:$0xf] }
  0x1f   :  { %200 = vmatpush.bf16.msra.mxu0 %v475_v16  ;;  %377 = vmatpush.bf16.msra.mxu3 %v591_v31  ;;  %v590_v39 = vld [vmem:[#allocation9 + $0x68] sm:$0xff]  ;;  %v581_v46 = vld [vmem:[#allocation9 + $0x20] sm:$0xff]  ;;  %v447_v49 = vor.u32 %v563_v44, %v444_v45  ;;  %v560_v56 = vld [vmem:[#allocation3] sm:$0xff] }
  0x20   :  { %214 = vmatpush.bf16.msra.mxu1 %v479_v17  ;;  %v442_v42 = vld [vmem:[#allocation6 + $0x10] sm:$0xf]  ;;  %v589_v47 = vld [vmem:[#allocation9 + $0x60] sm:$0xff]  ;;  %v436_v53 = vld [vmem:[#allocation6 + $0x8] sm:$0xf0] }
  0x21   :  { %v443_v48 = vor.u32 %v564_v43, %v442_v42  ;;  %v434_v50 = vld [vmem:[#allocation6] sm:$0xf]  ;;  %v562_v51 = vld [vmem:[#allocation6 + $0x4] sm:$0xf0]  ;;  %v561_v52 = vld [vmem:[#allocation6 + $0x4] sm:$0xf] }
  0x22   :  { %364 = vmatpush.bf16.msra.mxu2 %v582_v38  ;;  %v435_v54 = vor.u32 %v562_v51, %v434_v50  ;;  %v439_v55 = vor.u32 %v561_v52, %v436_v53  ;;  %v580_v57 = vld [vmem:[#allocation9 + $0x18] sm:$0xff]  ;;  %v579_v59 = vld [vmem:[#allocation9 + $0x10] sm:$0xff]  ;;  %v578_v61 = vld [vmem:[#allocation9 + $0x8] sm:$0xff] }
  0x23   :  { %201 = vmatpush.bf16.msra.mxu0 %v467_v22  ;;  %378 = vmatpush.bf16.msra.mxu3 %v590_v39  ;;  %v588_v58 = vld [vmem:[#allocation9 + $0x58] sm:$0xff]  ;;  %v587_v60 = vld [vmem:[#allocation9 + $0x50] sm:$0xff]  ;;  %v586_v62 = vld [vmem:[#allocation9 + $0x48] sm:$0xff] }
  0x24   :  { %215 = vmatpush.bf16.msra.mxu1 %v471_v25  ;;  %v577_v63 = vld [vmem:[#allocation9] sm:$0xff]  ;;  %v106_v1 = vld [vmem:[#allocation8] sm:$0x3]  ;;  %v602_v19 = vld [vmem:[%s798_s4] ss:$0 sm:$0xff] }
  0x25   :  { %v585_v0 = vld [vmem:[#allocation9 + $0x40] sm:$0xff]  ;;  %v108_v4 = vperm.slane %v106_v1, 0  ;;  %v109_v5 = vperm.slane %v106_v1, 1 }
  0x26   :  { %365 = vmatpush.bf16.msra.mxu2 %v581_v46 }
  0x27   :  { %202 = vmatpush.bf16.msra.mxu0 %v459_v32  ;;  %379 = vmatpush.bf16.msra.mxu3 %v589_v47 }
  0x28   :  { %216 = vmatpush.bf16.msra.mxu1 %v463_v33 }
  0x2a   :  { %366 = vmatpush.bf16.msra.mxu2 %v580_v57 }
  0x2b   :  { %203 = vmatpush.bf16.msra.mxu0 %v451_v40  ;;  %380 = vmatpush.bf16.msra.mxu3 %v588_v58 }
  0x2c   :  { %217 = vmatpush.bf16.msra.mxu1 %v455_v41 }
  0x2e   :  { %367 = vmatpush.bf16.msra.mxu2 %v579_v59 }
  0x2f   :  { %204 = vmatpush.bf16.msra.mxu0 %v443_v48  ;;  %381 = vmatpush.bf16.msra.mxu3 %v587_v60 }
  0x30   :  { %218 = vmatpush.bf16.msra.mxu1 %v447_v49 }
  0x32   :  { %368 = vmatpush.bf16.msra.mxu2 %v578_v61 }
  0x33   :  { %205 = vmatpush.bf16.msra.mxu0 %v435_v54  ;;  %382 = vmatpush.bf16.msra.mxu3 %v586_v62 }
  0x34   :  { %219 = vmatpush.bf16.msra.mxu1 %v439_v55 }
  0x36   :  { %206 = vmatmul.bf16.vlgmr.msra.gmra.mxu0 %v560_v56  ;;  %369 = vmatpush.bf16.msra.mxu2 %v577_v63 }
  0x37   :  { %220 = vmatmul.bf16.vlgmr.msra.gmra.mxu1 %v560_v56  ;;  %383 = vmatpush.bf16.msra.mxu3 %v585_v0 }
  0xb3   :  { %v207_v2 = vpop.f32.mrf.mxu0 }
  0xb4   :  { %v221_v3 = vpop.f32.mrf.mxu1  ;;  %v208_v6 = vadd.f32 %v207_v2, %v108_v4 }
  0xb5   :  { %v222_v7 = vadd.f32 %v221_v3, %v109_v5 }
  0xb6   :  { %v226_v12 = vmax.f32 %v208_v6, 0.0 }
  0xb7   :  { %v227_v14 = vmax.f32 %v222_v7, 0.0 }
  0xbb   :  { %v209_v8 = vpop.f32.mrf.mxu0 }
  0xbc   :  { %v210_v9 = vadd.f32 %v209_v8, %v108_v4  ;;  %v223_v10 = vpop.f32.mrf.mxu1 }
  0xbd   :  { %v224_v11 = vadd.f32 %v223_v10, %v109_v5 }
  0xbe   :  { %v228_v13 = vmax.f32 %v210_v9, 0.0 }
  0xbf   :  { %v229_v15 = vmax.f32 %v224_v11, 0.0 }
  0xc0   :  { %v232_v16 = vpack.c.bf16 %v228_v13, %v226_v12 }
  0xc1   :  { %v233_v17 = vpack.c.bf16 %v229_v15, %v227_v14 }
  0xc2   :  { %370 = vmatmul.bf16.vlgmr.msra.gmra.mxu2 %v232_v16 }
  0xc3   :  { %384 = vmatmul.bf16.vlgmr.msra.gmra.mxu3 %v233_v17 }
 0x145   :  { %v371_v18 = vpop.f32.mrf.mxu2 }
 0x146   :  { %v385_v20 = vpop.f32.mrf.mxu3 }
 0x147   :  { %v386_v21 = vadd.f32 %v385_v20, %v371_v18 }
 0x149   :  { %v403_v22 = vadd.f32 %v602_v19, %v386_v21 }
 0x14b   :  { %405 = vst [vmem:[#allocation11] sm:$0xff] %v403_v22 }
 0x14d   :  { %v373_v23 = vpop.f32.mrf.mxu2 }
 0x14e   :  { %v387_v24 = vpop.f32.mrf.mxu3 }
 0x14f   :  { %v388_v25 = vadd.f32 %v387_v24, %v373_v23 }
 0x151   :  { %v404_v26 = vadd.f32 %v602_v19, %v388_v25 }
 0x153   :  { %406 = vst [vmem:[#allocation11 + $0x8] sm:$0xff] %v404_v26 }
 0x154   :  { %419 = dma.vmem_to_hbm [thread:$0]  %s412_s16, 256, %s414_s19, [#allocation5], %s732_s26, %s732_s26, %s733_s27  }
 0x155   :  { %729 = dma.done.wait [#allocation5], 256  }
 0x156   :  { %730 = vsyncadd [#allocation5], 4294967040 }
 0x157   :  { %424 = vsyncpa [#allocation4], 1 }
 0x158   :  { %425 = vsyncpa [#allocation7], 1 }
 0x159   :  { %426 = vsyncpa [#allocation10], 1 }
 0x15a   :  { %427 = vsyncpa [#allocation5], 1 }

</bundles_post_ra>
